<compile_context>
chip_gen: v5e
topology: v5e:2x2
jax: 0.10.0
libtpu: 0.0.40
codegen_flags: <defaults>
</compile_context>

<pallas_src>
import functools

import jax
import jax.numpy as jnp
from jax.experimental import pallas as pl
from jax.experimental.pallas import tpu as pltpu


# ----------------------------------------------------------------------------
# Fused roll + blend kernel.
# Grid = (K-1 pairs, R tiles).  For pair i the inputs are the ORIGINAL
# keyframes at (i+1)%K and (i+2)%K (== rolled[i], rolled[i+1]); all `fps`
# alpha blends are computed in one invocation and written as a single
# (fps, TILE_R, 128) output block.
# ----------------------------------------------------------------------------
def _blend_pair_kernel(a_ref, b_ref, o_ref, *, fps):
    out_dtype = o_ref.dtype
    a = a_ref[0].astype(jnp.float32)           # (TILE_R, 128)
    b = b_ref[0].astype(jnp.float32)           # (TILE_R, 128)
    # alpha = j / fps are compile-time Python scalars, so the fps loop is a
    # static unroll of scalar-weighted axpy ops (VPU work is free filler under
    # the HBM bound); no vector iota / broadcast materialization needed.
    for j in range(fps):
        alpha = j / fps
        val = (1.0 - alpha) * a + alpha * b    # (TILE_R, 128) f32
        if jnp.issubdtype(out_dtype, jnp.integer):
            info = jnp.iinfo(out_dtype)
            # cv2.addWeighted-style round-half-up + saturate before the cast.
            val = jnp.clip(jnp.floor(val + 0.5), info.min, info.max)
        o_ref[j] = val.astype(out_dtype)


def _choose_tile_r(R, fps, in_itemsize, out_itemsize, budget_bytes):
    """Largest R tile whose double-buffered pipeline footprint fits the budget."""
    def footprint(tr):
        in_blocks = 2 * tr * 128 * in_itemsize          # a + b input blocks
        out_block = fps * tr * 128 * out_itemsize       # all fps frames of the tile
        return 2 * (in_blocks + out_block)              # x2 for double buffering

    if footprint(R) <= budget_bytes:
        return R                                        # whole frame per grid step
    best = 0
    tr = 8
    while tr < R:                                       # multiples of 8 sublanes only
        if R % tr == 0 and footprint(tr) <= budget_bytes:
            best = tr
        tr += 8
    if best > 0:
        return best
    return 8 if R % 8 == 0 else R                       # fallback for odd shapes


def interpolate_video(frames_2d, fps, out_dtype=None, *,
                      vmem_budget_bytes=24 << 20):
    """frames_2d: (K, R, 128).  Returns ((K-1)*fps, R, 128) blended video."""
    K, R, L = frames_2d.shape
    assert L == 128
    n_pairs = K - 1
    out_dtype = frames_2d.dtype if out_dtype is None else jnp.dtype(out_dtype)

    tile_r = _choose_tile_r(R, fps, jnp.dtype(frames_2d.dtype).itemsize,
                            out_dtype.itemsize, vmem_budget_bytes)
    n_r_tiles = R // tile_r

    kernel = functools.partial(_blend_pair_kernel, fps=fps)
    return pl.pallas_call(
        kernel,
        out_shape=jax.ShapeDtypeStruct((n_pairs * fps, R, 128), out_dtype),
        grid=(n_pairs, n_r_tiles),
        in_specs=[
            # roll(-1) fused into the index_maps: rolled[i]   = orig[(i+1) % K]
            #                                     rolled[i+1] = orig[(i+2) % K]
            pl.BlockSpec((1, tile_r, 128), lambda i, r: ((i + 1) % K, r, 0)),
            pl.BlockSpec((1, tile_r, 128), lambda i, r: ((i + 2) % K, r, 0)),
        ],
        out_specs=pl.BlockSpec((fps, tile_r, 128), lambda i, r: (i, r, 0)),
        compiler_params=pltpu.CompilerParams(
            dimension_semantics=("parallel", "parallel"),
            vmem_limit_bytes=32 << 20,
        ),
    )(frames_2d, frames_2d)


# ----------------------------------------------------------------------------
# Forward wrapper (glue: reshapes + the cheap jnp.roll for the exported
# keyframes; the roll used by the blend itself is fused into the kernel).
# ----------------------------------------------------------------------------
def prompt2vid_forward(keyframes, fps, video_dtype=None):
    """keyframes: (K, H, W, C).  Returns (rolled_keyframes, video)."""
    # TODO(synk): Prompt2Img diffusion keyframe generation (text prompt -> images)
    #             is a full generative model; keyframes are a tensor input here.
    # TODO(synk): InterpolateKeyframes (IFRNet) is a full neural net; the explicit
    #             cv2.addWeighted interpolation loop from forward() is what is
    #             implemented as the Pallas kernel.
    # TODO(synk): cv2.resize to 512x512, RGB->BGR, mp4/gif encoding and all file
    #             I/O are non-tensor side effects and are omitted.
    K, H, W, C = keyframes.shape
    assert (H * W * C) % 128 == 0, "frame size must flatten to multiples of 128 lanes"
    R = (H * W * C) // 128

    frames_2d = keyframes.reshape(K, R, 128)
    # The module keeps the rolled keyframes around for image export; a single
    # XLA copy suffices (the blend kernel never re-reads this array).
    rolled = jnp.roll(keyframes, -1, axis=0)

    video_2d = interpolate_video(frames_2d, fps, out_dtype=video_dtype)
    video = video_2d.reshape((K - 1) * fps, H, W, C)
    return rolled, video


if __name__ == "__main__":
    key = jax.random.PRNGKey(0)
    K, H, W, C = 4, 16, 16, 3          # 4 keyframes, 16x16 RGB (H*W*C = 768 = 6*128)
    fps = 8

    keyframes = jax.random.uniform(key, (K, H, W, C), dtype=jnp.float32)

    # f32 video: exact-semantics check.
    rolled, video = prompt2vid_forward(keyframes, fps)
    # bf16 video: cast-on-store path that halves the dominant HBM write traffic.
    _, video_bf16 = prompt2vid_forward(keyframes, fps, video_dtype=jnp.bfloat16)
    jax.block_until_ready((rolled, video, video_bf16))

    # Reference (pure jnp) of the same semantics.
    ref_rolled = jnp.roll(keyframes, -1, axis=0)
    alphas = (jnp.arange(fps, dtype=jnp.float32) / fps)[None, :, None, None, None]
    ref_video = ((1.0 - alphas) * ref_rolled[:-1, None]
                 + alphas * ref_rolled[1:, None]).reshape((K - 1) * fps, H, W, C)

    assert rolled.shape == (K, H, W, C)
    assert video.shape == ((K - 1) * fps, H, W, C)
    assert jnp.allclose(rolled, ref_rolled, atol=1e-6)
    assert jnp.allclose(video, ref_video, atol=1e-5)
    assert jnp.allclose(video_bf16.astype(jnp.float32), ref_video, atol=1e-2)

    print("KERNEL_OK")
</pallas_src>

<mosaic_0001>
module attributes {stable_mosaic.version = 11 : i64} {
  func.func @_blend_pair_kernel(%arg0: i32, %arg1: i32, %arg2: memref<1x6x128xf32, #tpu.memory_space<vmem>>, %arg3: memref<1x6x128xf32, #tpu.memory_space<vmem>>, %arg4: memref<8x6x128xf32, #tpu.memory_space<vmem>>) attributes {dimension_semantics = [#tpu.dimension_semantics<parallel>, #tpu.dimension_semantics<parallel>], iteration_bounds = array<i64: 3, 1>, scalar_prefetch = 0 : i64, scratch_operands = 0 : i64, tpu.core_type = #tpu.core_type<tc>, window_params = [{transform_indices = @transform_0, window_bounds = array<i64: 1, 6, 128>}, {transform_indices = @transform_1, window_bounds = array<i64: 1, 6, 128>}, {transform_indices = @transform_2, window_bounds = array<i64: 8, 6, 128>}]} {
    %c0 = arith.constant 0 : index
    %c0_0 = arith.constant 0 : index
    %c0_1 = arith.constant 0 : index
    %0 = vector.load %arg2[%c0, %c0_0, %c0_1] : memref<1x6x128xf32, #tpu.memory_space<vmem>>, vector<1x6x128xf32>
    %1 = vector.shape_cast %0 : vector<1x6x128xf32> to vector<6x128xf32>
    %c0_2 = arith.constant 0 : index
    %c0_3 = arith.constant 0 : index
    %c0_4 = arith.constant 0 : index
    %2 = vector.load %arg3[%c0_2, %c0_3, %c0_4] : memref<1x6x128xf32, #tpu.memory_space<vmem>>, vector<1x6x128xf32>
    %3 = vector.shape_cast %2 : vector<1x6x128xf32> to vector<6x128xf32>
    %cst = arith.constant 1.000000e+00 : f32
    %4 = vector.broadcast %cst : f32 to vector<6x128xf32>
    %5 = arith.mulf %4, %1 : vector<6x128xf32>
    %cst_5 = arith.constant 0.000000e+00 : f32
    %6 = vector.broadcast %cst_5 : f32 to vector<6x128xf32>
    %7 = arith.mulf %6, %3 : vector<6x128xf32>
    %8 = arith.addf %5, %7 : vector<6x128xf32>
    %c0_6 = arith.constant 0 : index
    %c0_7 = arith.constant 0 : index
    %c0_8 = arith.constant 0 : index
    %9 = vector.load %arg4[%c0_6, %c0_7, %c0_8] : memref<8x6x128xf32, #tpu.memory_space<vmem>>, vector<1x6x128xf32>
    %10 = vector.shape_cast %9 : vector<1x6x128xf32> to vector<6x128xf32>
    %11 = vector.shape_cast %8 : vector<6x128xf32> to vector<1x6x128xf32>
    tpu.vector_store %arg4[%c0_6, %c0_7, %c0_8], %11 {strides = array<i32>} : memref<8x6x128xf32, #tpu.memory_space<vmem>>, vector<1x6x128xf32>,
    %cst_9 = arith.constant 8.750000e-01 : f32
    %12 = vector.broadcast %cst_9 : f32 to vector<6x128xf32>
    %13 = arith.mulf %12, %1 : vector<6x128xf32>
    %cst_10 = arith.constant 1.250000e-01 : f32
    %14 = vector.broadcast %cst_10 : f32 to vector<6x128xf32>
    %15 = arith.mulf %14, %3 : vector<6x128xf32>
    %16 = arith.addf %13, %15 : vector<6x128xf32>
    %c1 = arith.constant 1 : index
    %c0_11 = arith.constant 0 : index
    %c0_12 = arith.constant 0 : index
    %17 = vector.load %arg4[%c1, %c0_11, %c0_12] : memref<8x6x128xf32, #tpu.memory_space<vmem>>, vector<1x6x128xf32>
    %18 = vector.shape_cast %17 : vector<1x6x128xf32> to vector<6x128xf32>
    %19 = vector.shape_cast %16 : vector<6x128xf32> to vector<1x6x128xf32>
    tpu.vector_store %arg4[%c1, %c0_11, %c0_12], %19 {strides = array<i32>} : memref<8x6x128xf32, #tpu.memory_space<vmem>>, vector<1x6x128xf32>,
    %cst_13 = arith.constant 7.500000e-01 : f32
    %20 = vector.broadcast %cst_13 : f32 to vector<6x128xf32>
    %21 = arith.mulf %20, %1 : vector<6x128xf32>
    %cst_14 = arith.constant 2.500000e-01 : f32
    %22 = vector.broadcast %cst_14 : f32 to vector<6x128xf32>
    %23 = arith.mulf %22, %3 : vector<6x128xf32>
    %24 = arith.addf %21, %23 : vector<6x128xf32>
    %c2 = arith.constant 2 : index
    %c0_15 = arith.constant 0 : index
    %c0_16 = arith.constant 0 : index
    %25 = vector.load %arg4[%c2, %c0_15, %c0_16] : memref<8x6x128xf32, #tpu.memory_space<vmem>>, vector<1x6x128xf32>
    %26 = vector.shape_cast %25 : vector<1x6x128xf32> to vector<6x128xf32>
    %27 = vector.shape_cast %24 : vector<6x128xf32> to vector<1x6x128xf32>
    tpu.vector_store %arg4[%c2, %c0_15, %c0_16], %27 {strides = array<i32>} : memref<8x6x128xf32, #tpu.memory_space<vmem>>, vector<1x6x128xf32>,
    %cst_17 = arith.constant 6.250000e-01 : f32
    %28 = vector.broadcast %cst_17 : f32 to vector<6x128xf32>
    %29 = arith.mulf %28, %1 : vector<6x128xf32>
    %cst_18 = arith.constant 3.750000e-01 : f32
    %30 = vector.broadcast %cst_18 : f32 to vector<6x128xf32>
    %31 = arith.mulf %30, %3 : vector<6x128xf32>
    %32 = arith.addf %29, %31 : vector<6x128xf32>
    %c3 = arith.constant 3 : index
    %c0_19 = arith.constant 0 : index
    %c0_20 = arith.constant 0 : index
    %33 = vector.load %arg4[%c3, %c0_19, %c0_20] : memref<8x6x128xf32, #tpu.memory_space<vmem>>, vector<1x6x128xf32>
    %34 = vector.shape_cast %33 : vector<1x6x128xf32> to vector<6x128xf32>
    %35 = vector.shape_cast %32 : vector<6x128xf32> to vector<1x6x128xf32>
    tpu.vector_store %arg4[%c3, %c0_19, %c0_20], %35 {strides = array<i32>} : memref<8x6x128xf32, #tpu.memory_space<vmem>>, vector<1x6x128xf32>,
    %cst_21 = arith.constant 5.000000e-01 : f32
    %36 = vector.broadcast %cst_21 : f32 to vector<6x128xf32>
    %37 = arith.mulf %36, %1 : vector<6x128xf32>
    %cst_22 = arith.constant 5.000000e-01 : f32
    %38 = vector.broadcast %cst_22 : f32 to vector<6x128xf32>
    %39 = arith.mulf %38, %3 : vector<6x128xf32>
    %40 = arith.addf %37, %39 : vector<6x128xf32>
    %c4 = arith.constant 4 : index
    %c0_23 = arith.constant 0 : index
    %c0_24 = arith.constant 0 : index
    %41 = vector.load %arg4[%c4, %c0_23, %c0_24] : memref<8x6x128xf32, #tpu.memory_space<vmem>>, vector<1x6x128xf32>
    %42 = vector.shape_cast %41 : vector<1x6x128xf32> to vector<6x128xf32>
    %43 = vector.shape_cast %40 : vector<6x128xf32> to vector<1x6x128xf32>
    tpu.vector_store %arg4[%c4, %c0_23, %c0_24], %43 {strides = array<i32>} : memref<8x6x128xf32, #tpu.memory_space<vmem>>, vector<1x6x128xf32>,
    %cst_25 = arith.constant 3.750000e-01 : f32
    %44 = vector.broadcast %cst_25 : f32 to vector<6x128xf32>
    %45 = arith.mulf %44, %1 : vector<6x128xf32>
    %cst_26 = arith.constant 6.250000e-01 : f32
    %46 = vector.broadcast %cst_26 : f32 to vector<6x128xf32>
    %47 = arith.mulf %46, %3 : vector<6x128xf32>
    %48 = arith.addf %45, %47 : vector<6x128xf32>
    %c5 = arith.constant 5 : index
    %c0_27 = arith.constant 0 : index
    %c0_28 = arith.constant 0 : index
    %49 = vector.load %arg4[%c5, %c0_27, %c0_28] : memref<8x6x128xf32, #tpu.memory_space<vmem>>, vector<1x6x128xf32>
    %50 = vector.shape_cast %49 : vector<1x6x128xf32> to vector<6x128xf32>
    %51 = vector.shape_cast %48 : vector<6x128xf32> to vector<1x6x128xf32>
    tpu.vector_store %arg4[%c5, %c0_27, %c0_28], %51 {strides = array<i32>} : memref<8x6x128xf32, #tpu.memory_space<vmem>>, vector<1x6x128xf32>,
    %cst_29 = arith.constant 2.500000e-01 : f32
    %52 = vector.broadcast %cst_29 : f32 to vector<6x128xf32>
    %53 = arith.mulf %52, %1 : vector<6x128xf32>
    %cst_30 = arith.constant 7.500000e-01 : f32
    %54 = vector.broadcast %cst_30 : f32 to vector<6x128xf32>
    %55 = arith.mulf %54, %3 : vector<6x128xf32>
    %56 = arith.addf %53, %55 : vector<6x128xf32>
    %c6 = arith.constant 6 : index
    %c0_31 = arith.constant 0 : index
    %c0_32 = arith.constant 0 : index
    %57 = vector.load %arg4[%c6, %c0_31, %c0_32] : memref<8x6x128xf32, #tpu.memory_space<vmem>>, vector<1x6x128xf32>
    %58 = vector.shape_cast %57 : vector<1x6x128xf32> to vector<6x128xf32>
    %59 = vector.shape_cast %56 : vector<6x128xf32> to vector<1x6x128xf32>
    tpu.vector_store %arg4[%c6, %c0_31, %c0_32], %59 {strides = array<i32>} : memref<8x6x128xf32, #tpu.memory_space<vmem>>, vector<1x6x128xf32>,
    %cst_33 = arith.constant 1.250000e-01 : f32
    %60 = vector.broadcast %cst_33 : f32 to vector<6x128xf32>
    %61 = arith.mulf %60, %1 : vector<6x128xf32>
    %cst_34 = arith.constant 8.750000e-01 : f32
    %62 = vector.broadcast %cst_34 : f32 to vector<6x128xf32>
    %63 = arith.mulf %62, %3 : vector<6x128xf32>
    %64 = arith.addf %61, %63 : vector<6x128xf32>
    %c7 = arith.constant 7 : index
    %c0_35 = arith.constant 0 : index
    %c0_36 = arith.constant 0 : index
    %65 = vector.load %arg4[%c7, %c0_35, %c0_36] : memref<8x6x128xf32, #tpu.memory_space<vmem>>, vector<1x6x128xf32>
    %66 = vector.shape_cast %65 : vector<1x6x128xf32> to vector<6x128xf32>
    %67 = vector.shape_cast %64 : vector<6x128xf32> to vector<1x6x128xf32>
    tpu.vector_store %arg4[%c7, %c0_35, %c0_36], %67 {strides = array<i32>} : memref<8x6x128xf32, #tpu.memory_space<vmem>>, vector<1x6x128xf32>,
    return
  }
  func.func @transform_0(%arg0: i32, %arg1: i32) -> (i32, i32, i32) {
    %c1_i32 = arith.constant 1 : i32
    %0 = arith.addi %arg0, %c1_i32 : i32
    %c4_i32 = arith.constant 4 : i32
    %c0_i32 = arith.constant 0 : i32
    %1 = arith.cmpi eq, %c4_i32, %c0_i32 : i32
    %c1_i32_0 = arith.constant 1 : i32
    %2 = arith.select %1, %c1_i32_0, %c4_i32 : i32
    %3 = arith.remsi %0, %2 : i32
    %c0_i32_1 = arith.constant 0 : i32
    %4 = arith.cmpi ne, %3, %c0_i32_1 : i32
    %c0_i32_2 = arith.constant 0 : i32
    %5 = arith.cmpi slt, %3, %c0_i32_2 : i32
    %c0_i32_3 = arith.constant 0 : i32
    %6 = arith.cmpi slt, %2, %c0_i32_3 : i32
    %7 = arith.xori %5, %6 : i1
    %8 = arith.andi %7, %4 : i1
    %9 = arith.addi %3, %2 : i32
    %10 = arith.select %8, %9, %3 : i32
    %c0_i32_4 = arith.constant 0 : i32
    %c0_i32_5 = arith.constant 0 : i32
    return %10, %arg1, %c0_i32_4 : i32, i32, i32
  }
  func.func @transform_1(%arg0: i32, %arg1: i32) -> (i32, i32, i32) {
    %c2_i32 = arith.constant 2 : i32
    %0 = arith.addi %arg0, %c2_i32 : i32
    %c4_i32 = arith.constant 4 : i32
    %c0_i32 = arith.constant 0 : i32
    %1 = arith.cmpi eq, %c4_i32, %c0_i32 : i32
    %c1_i32 = arith.constant 1 : i32
    %2 = arith.select %1, %c1_i32, %c4_i32 : i32
    %3 = arith.remsi %0, %2 : i32
    %c0_i32_0 = arith.constant 0 : i32
    %4 = arith.cmpi ne, %3, %c0_i32_0 : i32
    %c0_i32_1 = arith.constant 0 : i32
    %5 = arith.cmpi slt, %3, %c0_i32_1 : i32
    %c0_i32_2 = arith.constant 0 : i32
    %6 = arith.cmpi slt, %2, %c0_i32_2 : i32
    %7 = arith.xori %5, %6 : i1
    %8 = arith.andi %7, %4 : i1
    %9 = arith.addi %3, %2 : i32
    %10 = arith.select %8, %9, %3 : i32
    %c0_i32_3 = arith.constant 0 : i32
    %c0_i32_4 = arith.constant 0 : i32
    return %10, %arg1, %c0_i32_3 : i32, i32, i32
  }
  func.func @transform_2(%arg0: i32, %arg1: i32) -> (i32, i32, i32) {
    %c0_i32 = arith.constant 0 : i32
    %c0_i32_0 = arith.constant 0 : i32
    return %arg0, %arg1, %c0_i32 : i32, i32, i32
  }
}

</mosaic_0001>

<bundles_post_ra>
// kernel: tpu_custom_call.1
= control target key start
LH: loop header
LB: loop body
LE: loop exit
PB: predicated region body
PF: predicated region fallthrough
CT: control target
= control target key end

     0   :  { %s615_s9 = smov 0   ;;  %s617_s10 = smov 0   ;;  %s656_s0 = inlined_call_operand.vmem [shape: f32[4,6,128], index: 0, kind: input, shape index: {}]   ;;  %s657_s1 = inlined_call_operand.vmem [shape: f32[4,6,128], index: 1, kind: input, shape index: {}]   ;;  %s658_s2 = inlined_call_operand.vmem [shape: f32[24,6,128], index: 2, kind: output, shape index: {}]  }
   0x1   :  { %s619_s11 = smov 0  }
   0x2 LB: > { %s24_s12 = sadd.s32 1, %s594_s10  ;;  %p532_p0 = scmp.ge.s32.totalorder %s598_s11, 1  ;;  %s598_s11 = sphi %s619_s11, %s12_s11   ;;  %s594_s10 = sphi %s617_s10, %s660_s10   ;;  %s590_s9 = sphi %s615_s9, %s659_s9  }
   0x3   : > { %p26_p1 = scmp.ge.s32.totalorder %s24_s12, 3  ;;  %p248_p2 = scmp.lt.s32.totalorder %s598_s11, 4 }
   0x5   : > { %s662_s12 = smov (%p26_p1, %s24_s12), 0  ;;  %p249_p3 = pnand %p532_p0, %p248_p2 }
   0x6   : > { %s308_s13 = sadd.s32 (!%p249_p3), 1, %s590_s9  ;;  %s341_s14 = sadd.s32 (!%p249_p3), 2, %s590_s9 }
   0x7   : > { %252 = sbr.rel (%p249_p3) target bundleno = 37 (0x25), region = 28  ;;  %p309_p4 = scmp.lt.s32.totalorder (!%p249_p3), %s308_s13, 0 }
   0x8   : > { %s310_s15 = ssub.s32 (!%p249_p3), 0, %s308_s13  ;;  %s343_s18 = ssub.s32 (!%p249_p3), 0, %s341_s14 }
   0x9   : > { %s533_s16 = smin.u32 (!%p249_p3), %s310_s15, %s308_s13  ;;  %s537_s20 = smin.u32 (!%p249_p3), %s343_s18, %s341_s14 }
   0xa   : > { %s312_s17 = sand.u32 (!%p249_p3), 3, %s533_s16   ;;  %p342_p5 = scmp.lt.s32.totalorder (!%p249_p3), %s341_s14, 0 }
   0xb   : > { %s313_s19 = ssub.s32 (!%p249_p3), 0, %s312_s17  ;;  %s345_s21 = sand.u32 (!%p249_p3), 3, %s537_s20  }
   0xc   : > { %s664_s19 = smov (!%p309_p4, %s313_s19), %s312_s17  ;;  %s346_s23 = ssub.s32 0, %s345_s21 }
   0xd   : > { %p535_p6 = scmp.lt.s32.totalorder %s664_s19, 0  ;;  %s319_s22 = sadd.s32 4, %s664_s19 }
   0xe   : > { %s541_s24 = sshll.u32 %s590_s9, 3  ;;  %s668_s23 = smov (!%p342_p5, %s346_s23), %s345_s21 }
   0xf   : > { %s666_s22 = smov (!%p535_p6, %s319_s22), %s664_s19  ;;  %p375_p8 = scmp.lt.s32.totalorder %s541_s24, 23 }
  0x10   : > { %p321_p7 = scmp.lt.s32.totalorder %s666_s22, 3  ;;  %p539_p9 = scmp.lt.s32.totalorder %s668_s23, 0 }
  0x11   : > { %s352_s25 = sadd.s32 4, %s668_s23  ;;  %s674_s24 = smov (!%p375_p8, %s541_s24), 23 }
  0x12   : > { %s670_s22 = smov (!%p321_p7, %s666_s22), 3  ;;  %s672_s25 = smov (!%p539_p9, %s352_s25), %s668_s23 }
  0x13   : > { %s536_s26 = sshll.u32 %s670_s22, 3  ;;  %p354_p10 = scmp.lt.s32.totalorder %s672_s25, 3 }
  0x14   : > { %s327_s29 = scalar_lea.vmem %s656_s0, %s536_s26  ;;  %s542_s6 = sshll.u32 %s674_s24, 3 }
  0x15   : > { %s676_s25 = smov (!%p354_p10, %s672_s25), 3  ;;  %v383_v0 = vld [vmem:[%s327_s29] sm:$0x3f]  ;;  %s381_s9 = scalar_lea.vmem %s658_s2, %s542_s6 }
  0x16   : > { %s540_s30 = sshll.u32 %s676_s25, 3  ;;  %v388_v1 = vmul.f32 0.875, %v383_v0  ;;  %v393_v2 = vmul.f32 0.75, %v383_v0  ;;  %v398_v4 = vmul.f32 0.625, %v383_v0  ;;  %v403_v5 = vmul.f32 0.5, %v383_v0 }
  0x17   : > { %s360_s5 = scalar_lea.vmem %s657_s1, %s540_s30  ;;  %v408_v11 = vmul.f32 0.375, %v383_v0  ;;  %v413_v13 = vmul.f32 0.25, %v383_v0  ;;  %v418_v19 = vmul.f32 0.125, %v383_v0 }
  0x18   : > { %v384_v3 = vld [vmem:[%s360_s5] sm:$0x3f] }
  0x19   : > { %v385_v6 = vmul.f32 0.0, %v384_v3  ;;  %v389_v7 = vmul.f32 0.125, %v384_v3  ;;  %v394_v8 = vmul.f32 0.25, %v384_v3  ;;  %v399_v9 = vmul.f32 0.375, %v384_v3 }
  0x1a   : > { %v404_v10 = vmul.f32 0.5, %v384_v3  ;;  %v409_v12 = vmul.f32 0.625, %v384_v3  ;;  %v414_v17 = vmul.f32 0.75, %v384_v3  ;;  %v419_v20 = vmul.f32 0.875, %v384_v3 }
  0x1b   : > { %v386_v14 = vadd.f32 %v385_v6, %v383_v0  ;;  %v390_v15 = vadd.f32 %v389_v7, %v388_v1  ;;  %v395_v16 = vadd.f32 %v394_v8, %v393_v2  ;;  %v400_v18 = vadd.f32 %v399_v9, %v398_v4 }
  0x1c   : > { %v405_v21 = vadd.f32 %v404_v10, %v403_v5  ;;  %v410_v22 = vadd.f32 %v409_v12, %v408_v11  ;;  %v415_v23 = vadd.f32 %v414_v17, %v413_v13  ;;  %v420_v24 = vadd.f32 %v419_v20, %v418_v19 }
  0x1d   : > { %387 = vst [vmem:[%s381_s9] sm:$0x3f] %v386_v14 }
  0x1e   : > { %543 = vst [vmem:[%s381_s9 + $0x8] sm:$0x3f] %v390_v15 }
  0x1f   : > { %544 = vst [vmem:[%s381_s9 + $0x10] sm:$0x3f] %v395_v16 }
  0x20   : > { %545 = vst [vmem:[%s381_s9 + $0x18] sm:$0x3f] %v400_v18 }
  0x21   : > { %546 = vst [vmem:[%s381_s9 + $0x20] sm:$0x3f] %v405_v21 }
  0x22   : > { %547 = vst [vmem:[%s381_s9 + $0x28] sm:$0x3f] %v410_v22 }
  0x23   : > { %548 = vst [vmem:[%s381_s9 + $0x30] sm:$0x3f] %v415_v23 }
  0x24   : > { %549 = vst [vmem:[%s381_s9 + $0x38] sm:$0x3f] %v420_v24 }
  0x25 PF: > { %s12_s11 = sadd.s32 1, %s598_s11   ;;  %s659_s9 = smov %s594_s10 }
  0x26   : > { %p9_p11 = scmp.ge.s32.totalorder %s12_s11, 5   ;;  %s660_s10 = smov %s662_s12 }
  0x28   :  { %11 = sbr.rel (!%p9_p11) target bundleno = 2 (0x2), region = 68 }

</bundles_post_ra>
